<compile_context>
chip_gen: v7x
topology: tpu7x:2x2x1
jax: 0.10.0
libtpu: 0.0.40
codegen_flags: <defaults>
</compile_context>

<pallas_src>
import jax
import jax.numpy as jnp
from jax.experimental import pallas as pl
from jax.experimental.pallas import tpu as pltpu

LANE = 128          # pad the hidden dim to a multiple of this (lane-dense intermediates)
SUBLANE = 8         # sublane granularity for the batch (row) axis
TILE_N_MAX = 1024   # rows per grid step; ~4 MiB working set at 1024, far below VMEM on all gens


def _round_up(x, m):
    return ((x + m - 1) // m) * m


# --------------------------------------------------------------------------- kernel
def _deepnet_kernel(x_ref,
                    w1_ref, b1_ref,
                    w2_ref, b2_ref,
                    w3_ref, b3_ref,
                    o_ref):
    # x tile: (tile_n, D_in) f32, unpadded features. BN1..BN3 are folded into (w*, b*).
    h = x_ref[...]

    # block 1: (BN1 folded) fc1 -> ReLU -> dropout(identity, eval)
    h = jnp.dot(h.astype(jnp.bfloat16), w1_ref[...],
                preferred_element_type=jnp.float32) + b1_ref[...]
    h = jnp.maximum(h, 0.0)

    # block 2: (BN2 folded) fc2 -> ReLU -> dropout(identity, eval)
    h = jnp.dot(h.astype(jnp.bfloat16), w2_ref[...],
                preferred_element_type=jnp.float32) + b2_ref[...]
    h = jnp.maximum(h, 0.0)

    # block 3: (BN3 folded) fc3 -> ReLU -> dropout(identity, eval)
    # w3/b3 are unpadded along D_out, so logits carry no padded lanes and no mask is needed.
    h = jnp.dot(h.astype(jnp.bfloat16), w3_ref[...],
                preferred_element_type=jnp.float32) + b3_ref[...]
    h = jnp.maximum(h, 0.0)

    # softmax over the feature axis (PyTorch implicit dim=1 for 2-D input); exact division so
    # rows sum to 1 within f32 rounding.
    m = jnp.max(h, axis=-1, keepdims=True)
    e = jnp.exp(h - m)
    denom = jnp.sum(e, axis=-1, keepdims=True)
    o_ref[...] = e / denom


# --------------------------------------------------------------------------- wrapper
def deepnet_forward(x, prep):
    """x: (N, D_in) float32.  prep: output of prepare_params (folded/padded/bf16 weights)."""
    N, D_in = x.shape
    w1, b1 = prep["w1"], prep["b1"]
    w2, b2 = prep["w2"], prep["b2"]
    w3, b3 = prep["w3"], prep["b3"]

    h_p = w1.shape[1]
    d_out = w3.shape[1]
    assert w1.shape[0] == D_in

    # Rows padded only to a sublane multiple; tile picked so the grid has >= 2 steps whenever
    # possible (lets ("parallel",) shard across v7x's 2 TensorCores) and divides n_pad exactly.
    n8 = _round_up(N, SUBLANE)
    num_tiles = pl.cdiv(n8, TILE_N_MAX)
    if n8 > SUBLANE:
        num_tiles = max(num_tiles, 2)
    tile_n = _round_up(pl.cdiv(n8, num_tiles), SUBLANE)
    n_pad = _round_up(n8, tile_n)

    x_p = x.astype(jnp.float32)
    if n_pad != N:
        x_p = jnp.pad(x_p, ((0, n_pad - N), (0, 0)))  # pad dead rows only (no feature padding)

    row_map = lambda i: (i, 0)     # x / out: one row-tile per grid step
    const_map = lambda i: (0, 0)   # weights / biases: VMEM-resident across the whole grid

    out_p = pl.pallas_call(
        _deepnet_kernel,
        out_shape=jax.ShapeDtypeStruct((n_pad, d_out), jnp.float32),
        grid=(n_pad // tile_n,),
        in_specs=[
            pl.BlockSpec((tile_n, D_in), row_map),   # last dim == full array dim -> OK
            pl.BlockSpec((D_in, h_p), const_map),
            pl.BlockSpec((1, h_p), const_map),
            pl.BlockSpec((h_p, h_p), const_map),
            pl.BlockSpec((1, h_p), const_map),
            pl.BlockSpec((h_p, d_out), const_map),   # last dim == full array dim -> OK
            pl.BlockSpec((1, d_out), const_map),
        ],
        out_specs=pl.BlockSpec((tile_n, d_out), row_map),
        compiler_params=pltpu.CompilerParams(
            dimension_semantics=("parallel",),
        ),
    )(x_p, w1, b1, w2, b2, w3, b3)

    return out_p if n_pad == N else out_p[:N]


# --------------------------------------------------------------------------- param prep
def fold_batchnorm(gamma, beta, mean, var, eps=1e-5):
    """bn(x) == x * scale + shift (eval mode)."""
    scale = gamma / jnp.sqrt(var + eps)
    shift = beta - mean * scale
    return scale, shift


def prepare_params(p, D_in, H, D_out):
    """Fold BN into the linears; pad only the hidden dim to 128 lanes; cast weights to bf16."""
    h_p = _round_up(H, LANE)

    s1, t1 = fold_batchnorm(p["g1"], p["be1"], p["m1"], p["v1"])
    s2, t2 = fold_batchnorm(p["g2"], p["be2"], p["m2"], p["v2"])
    s3, t3 = fold_batchnorm(p["g3"], p["be3"], p["m3"], p["v3"])

    # PyTorch Linear stores (out, in); transpose to (in, out) for x @ W,
    # then fold the preceding BN affine: x@(diag(s)W) + (t@W + b).
    w1 = p["w1"].T * s1[:, None]          # (D_in, H)
    b1 = p["b1"] + t1 @ p["w1"].T         # (H,)
    w2 = p["w2"].T * s2[:, None]          # (H, H)
    b2 = p["b2"] + t2 @ p["w2"].T         # (H,)
    w3 = p["w3"].T * s3[:, None]          # (H, D_out)
    b3 = p["b3"] + t3 @ p["w3"].T         # (D_out,)

    def pad_w(w, rows, cols):
        out = jnp.zeros((rows, cols), jnp.float32).at[: w.shape[0], : w.shape[1]].set(w)
        return out.astype(jnp.bfloat16)

    def pad_b(b, cols):
        return jnp.zeros((1, cols), jnp.float32).at[0, : b.shape[0]].set(b)

    return dict(
        w1=pad_w(w1, D_in, h_p), b1=pad_b(b1, h_p),     # K unpadded, hidden padded
        w2=pad_w(w2, h_p, h_p), b2=pad_b(b2, h_p),
        w3=pad_w(w3, h_p, D_out), b3=pad_b(b3, D_out),  # D_out unpadded -> narrow output store
    )


def init_params(key, D_in, H, D_out):
    """Torch-equivalent parameters: BN (gamma, beta, running stats) + Linear (out,in) weights."""
    ks = jax.random.split(key, 18)

    def bn(k0, k1, k2, k3, d):
        g = 1.0 + 0.1 * jax.random.normal(k0, (d,), jnp.float32)
        b = 0.1 * jax.random.normal(k1, (d,), jnp.float32)
        m = 0.05 * jax.random.normal(k2, (d,), jnp.float32)
        v = 1.0 + 0.1 * jax.random.uniform(k3, (d,), jnp.float32)
        return g, b, m, v

    g1, be1, m1, v1 = bn(ks[0], ks[1], ks[2], ks[3], D_in)
    g2, be2, m2, v2 = bn(ks[4], ks[5], ks[6], ks[7], H)
    g3, be3, m3, v3 = bn(ks[8], ks[9], ks[10], ks[11], H)

    def lin(kw, kb, fan_in, fan_out):
        w = (jax.random.uniform(kw, (fan_out, fan_in), jnp.float32) - 0.5) * (2.0 / jnp.sqrt(fan_in))
        b = (jax.random.uniform(kb, (fan_out,), jnp.float32) - 0.5) * (2.0 / jnp.sqrt(fan_in))
        return w, b

    w1, b1 = lin(ks[12], ks[13], D_in, H)
    w2, b2 = lin(ks[14], ks[15], H, H)
    w3, b3 = lin(ks[16], ks[17], H, D_out)

    return dict(g1=g1, be1=be1, m1=m1, v1=v1,
                g2=g2, be2=be2, m2=m2, v2=v2,
                g3=g3, be3=be3, m3=m3, v3=v3,
                w1=w1, b1=b1, w2=w2, b2=b2, w3=w3, b3=b3)


# --------------------------------------------------------------------------- references
def reference_forward_f32(x, p, eps=1e-5):
    """Pure-JAX f32 reference matching the PyTorch module in eval mode."""
    def bn(h, g, b, m, v):
        return (h - m) / jnp.sqrt(v + eps) * g + b

    h = bn(x, p["g1"], p["be1"], p["m1"], p["v1"])
    h = jnp.maximum(h @ p["w1"].T + p["b1"], 0.0)
    h = bn(h, p["g2"], p["be2"], p["m2"], p["v2"])
    h = jnp.maximum(h @ p["w2"].T + p["b2"], 0.0)
    h = bn(h, p["g3"], p["be3"], p["m3"], p["v3"])
    h = jnp.maximum(h @ p["w3"].T + p["b3"], 0.0)
    return jax.nn.softmax(h, axis=-1)


def reference_forward_matched(x, prep):
    """Reference with the kernel's precision policy (folded BN, bf16 matmul operands, f32 accum)."""
    def layer(h, w, b):
        y = jnp.dot(h.astype(jnp.bfloat16), w, preferred_element_type=jnp.float32) + b
        return jnp.maximum(y, 0.0)

    h = layer(x.astype(jnp.float32), prep["w1"], prep["b1"])
    h = layer(h, prep["w2"], prep["b2"])
    h = layer(h, prep["w3"], prep["b3"])
    return jax.nn.softmax(h, axis=-1)


# --------------------------------------------------------------------------- main
if __name__ == "__main__":
    # Small shapes consistent with the module: N batch rows of D_in features.
    D_in, H, D_out, N = 32, 64, 16, 8

    key = jax.random.PRNGKey(0)
    kx, kp = jax.random.split(key)
    x = jax.random.normal(kx, (N, D_in), jnp.float32)

    params = init_params(kp, D_in, H, D_out)
    prep = prepare_params(params, D_in, H, D_out)

    out = deepnet_forward(x, prep)
    out = jax.block_until_ready(out)

    assert out.shape == (N, D_out)

    # Tight check vs. a reference that uses the exact same numerics as the kernel.
    ref_matched = reference_forward_matched(x, prep)
    assert jnp.allclose(out, ref_matched, atol=1e-3, rtol=1e-3), "mismatch vs matched-precision reference"

    # Loose semantic check vs. the full-f32 module reference (bf16 matmul operands cause small drift).
    ref_f32 = reference_forward_f32(x, params)
    assert jnp.allclose(out, ref_f32, atol=3e-2, rtol=3e-2), "mismatch vs f32 module reference"

    # Rows of a softmax must sum to 1 (exact division -> only f32 rounding error).
    assert jnp.allclose(jnp.sum(out, axis=-1), jnp.ones((N,)), atol=1e-4)

    print("KERNEL_OK")
</pallas_src>

<mosaic_0001>
module attributes {stable_mosaic.version = 11 : i64} {
  func.func @_deepnet_kernel(%arg0: i32, %arg1: memref<8x32xf32, #tpu.memory_space<vmem>>, %arg2: memref<32x128xbf16, #tpu.memory_space<vmem>>, %arg3: memref<1x128xf32, #tpu.memory_space<vmem>>, %arg4: memref<128x128xbf16, #tpu.memory_space<vmem>>, %arg5: memref<1x128xf32, #tpu.memory_space<vmem>>, %arg6: memref<128x16xbf16, #tpu.memory_space<vmem>>, %arg7: memref<1x16xf32, #tpu.memory_space<vmem>>, %arg8: memref<8x16xf32, #tpu.memory_space<vmem>>) attributes {dimension_semantics = [#tpu.dimension_semantics<parallel>], iteration_bounds = array<i64: 1>, scalar_prefetch = 0 : i64, scratch_operands = 0 : i64, tpu.core_type = #tpu.core_type<tc>, window_params = [{transform_indices = @transform_0, window_bounds = array<i64: 8, 32>}, {pipeline_mode = #tpu.pipeline_mode<synchronous>, transform_indices = @transform_1, window_bounds = array<i64: 32, 128>}, {pipeline_mode = #tpu.pipeline_mode<synchronous>, transform_indices = @transform_2, window_bounds = array<i64: 1, 128>}, {pipeline_mode = #tpu.pipeline_mode<synchronous>, transform_indices = @transform_3, window_bounds = array<i64: 128, 128>}, {pipeline_mode = #tpu.pipeline_mode<synchronous>, transform_indices = @transform_4, window_bounds = array<i64: 1, 128>}, {pipeline_mode = #tpu.pipeline_mode<synchronous>, transform_indices = @transform_5, window_bounds = array<i64: 128, 16>}, {pipeline_mode = #tpu.pipeline_mode<synchronous>, transform_indices = @transform_6, window_bounds = array<i64: 1, 16>}, {transform_indices = @transform_7, window_bounds = array<i64: 8, 16>}]} {
    %c0 = arith.constant 0 : index
    %c0_0 = arith.constant 0 : index
    %0 = vector.load %arg1[%c0, %c0_0] : memref<8x32xf32, #tpu.memory_space<vmem>>, vector<8x32xf32>
    %1 = arith.truncf %0 : vector<8x32xf32> to vector<8x32xbf16>
    %c0_1 = arith.constant 0 : index
    %c0_2 = arith.constant 0 : index
    %2 = vector.load %arg2[%c0_1, %c0_2] : memref<32x128xbf16, #tpu.memory_space<vmem>>, vector<32x128xbf16>
    %cst = arith.constant dense<0.000000e+00> : vector<8x128xf32>
    %3 = tpu.matmul %1, %2, %cst {dimension_numbers = #tpu.dot_dimension_numbers<[1], [0], [0], [1], [0, 0, 1, 1], [], []>} : vector<8x32xbf16>, vector<32x128xbf16>, vector<8x128xf32> -> vector<8x128xf32>
    %c0_3 = arith.constant 0 : index
    %c0_4 = arith.constant 0 : index
    %4 = vector.load %arg3[%c0_3, %c0_4] : memref<1x128xf32, #tpu.memory_space<vmem>>, vector<1x128xf32>
    %5 = vector.broadcast %4 : vector<1x128xf32> to vector<8x128xf32>
    %6 = arith.addf %3, %5 : vector<8x128xf32>
    %cst_5 = arith.constant 0.000000e+00 : f32
    %7 = vector.broadcast %cst_5 : f32 to vector<8x128xf32>
    %8 = arith.maximumf %6, %7 : vector<8x128xf32>
    %9 = arith.truncf %8 : vector<8x128xf32> to vector<8x128xbf16>
    %c0_6 = arith.constant 0 : index
    %c0_7 = arith.constant 0 : index
    %10 = vector.load %arg4[%c0_6, %c0_7] : memref<128x128xbf16, #tpu.memory_space<vmem>>, vector<128x128xbf16>
    %cst_8 = arith.constant dense<0.000000e+00> : vector<8x128xf32>
    %11 = tpu.matmul %9, %10, %cst_8 {dimension_numbers = #tpu.dot_dimension_numbers<[1], [0], [0], [1], [0, 0, 1, 1], [], []>} : vector<8x128xbf16>, vector<128x128xbf16>, vector<8x128xf32> -> vector<8x128xf32>
    %c0_9 = arith.constant 0 : index
    %c0_10 = arith.constant 0 : index
    %12 = vector.load %arg5[%c0_9, %c0_10] : memref<1x128xf32, #tpu.memory_space<vmem>>, vector<1x128xf32>
    %13 = vector.broadcast %12 : vector<1x128xf32> to vector<8x128xf32>
    %14 = arith.addf %11, %13 : vector<8x128xf32>
    %cst_11 = arith.constant 0.000000e+00 : f32
    %15 = vector.broadcast %cst_11 : f32 to vector<8x128xf32>
    %16 = arith.maximumf %14, %15 : vector<8x128xf32>
    %17 = arith.truncf %16 : vector<8x128xf32> to vector<8x128xbf16>
    %c0_12 = arith.constant 0 : index
    %c0_13 = arith.constant 0 : index
    %18 = vector.load %arg6[%c0_12, %c0_13] : memref<128x16xbf16, #tpu.memory_space<vmem>>, vector<128x16xbf16>
    %cst_14 = arith.constant dense<0.000000e+00> : vector<8x16xf32>
    %19 = tpu.matmul %17, %18, %cst_14 {dimension_numbers = #tpu.dot_dimension_numbers<[1], [0], [0], [1], [0, 0, 1, 1], [], []>} : vector<8x128xbf16>, vector<128x16xbf16>, vector<8x16xf32> -> vector<8x16xf32>
    %c0_15 = arith.constant 0 : index
    %c0_16 = arith.constant 0 : index
    %20 = vector.load %arg7[%c0_15, %c0_16] : memref<1x16xf32, #tpu.memory_space<vmem>>, vector<1x16xf32>
    %21 = vector.broadcast %20 : vector<1x16xf32> to vector<8x16xf32>
    %22 = arith.addf %19, %21 : vector<8x16xf32>
    %cst_17 = arith.constant 0.000000e+00 : f32
    %23 = vector.broadcast %cst_17 : f32 to vector<8x16xf32>
    %24 = arith.maximumf %22, %23 : vector<8x16xf32>
    %cst_18 = arith.constant dense<0xFF800000> : vector<8xf32>
    %25 = vector.multi_reduction <maximumf>, %24, %cst_18 [1] : vector<8x16xf32> to vector<8xf32>
    %26 = vector.shape_cast %25 : vector<8xf32> to vector<8x1xf32>
    %27 = vector.broadcast %26 : vector<8x1xf32> to vector<8x16xf32>
    %28 = arith.subf %24, %27 : vector<8x16xf32>
    %29 = math.exp %28 : vector<8x16xf32>
    %cst_19 = arith.constant dense<0.000000e+00> : vector<8xf32>
    %30 = vector.multi_reduction <add>, %29, %cst_19 [1] : vector<8x16xf32> to vector<8xf32>
    %31 = vector.shape_cast %30 : vector<8xf32> to vector<8x1xf32>
    %32 = vector.broadcast %31 : vector<8x1xf32> to vector<8x16xf32>
    %33 = arith.divf %29, %32 : vector<8x16xf32>
    %c0_20 = arith.constant 0 : index
    %c0_21 = arith.constant 0 : index
    %34 = vector.load %arg8[%c0_20, %c0_21] : memref<8x16xf32, #tpu.memory_space<vmem>>, vector<8x16xf32>
    tpu.vector_store %arg8[%c0_20, %c0_21], %33 {strides = array<i32>} : memref<8x16xf32, #tpu.memory_space<vmem>>, vector<8x16xf32>,
    return
  }
  func.func @transform_0(%arg0: i32) -> (i32, i32) {
    %c0_i32 = arith.constant 0 : i32
    %c0_i32_0 = arith.constant 0 : i32
    return %arg0, %c0_i32 : i32, i32
  }
  func.func @transform_1(%arg0: i32) -> (i32, i32) {
    %c0_i32 = arith.constant 0 : i32
    %c0_i32_0 = arith.constant 0 : i32
    %c0_i32_1 = arith.constant 0 : i32
    return %c0_i32, %c0_i32_0 : i32, i32
  }
  func.func @transform_2(%arg0: i32) -> (i32, i32) {
    %c0_i32 = arith.constant 0 : i32
    %c0_i32_0 = arith.constant 0 : i32
    %c0_i32_1 = arith.constant 0 : i32
    return %c0_i32, %c0_i32_0 : i32, i32
  }
  func.func @transform_3(%arg0: i32) -> (i32, i32) {
    %c0_i32 = arith.constant 0 : i32
    %c0_i32_0 = arith.constant 0 : i32
    %c0_i32_1 = arith.constant 0 : i32
    return %c0_i32, %c0_i32_0 : i32, i32
  }
  func.func @transform_4(%arg0: i32) -> (i32, i32) {
    %c0_i32 = arith.constant 0 : i32
    %c0_i32_0 = arith.constant 0 : i32
    %c0_i32_1 = arith.constant 0 : i32
    return %c0_i32, %c0_i32_0 : i32, i32
  }
  func.func @transform_5(%arg0: i32) -> (i32, i32) {
    %c0_i32 = arith.constant 0 : i32
    %c0_i32_0 = arith.constant 0 : i32
    %c0_i32_1 = arith.constant 0 : i32
    return %c0_i32, %c0_i32_0 : i32, i32
  }
  func.func @transform_6(%arg0: i32) -> (i32, i32) {
    %c0_i32 = arith.constant 0 : i32
    %c0_i32_0 = arith.constant 0 : i32
    %c0_i32_1 = arith.constant 0 : i32
    return %c0_i32, %c0_i32_0 : i32, i32
  }
  func.func @transform_7(%arg0: i32) -> (i32, i32) {
    %c0_i32 = arith.constant 0 : i32
    %c0_i32_0 = arith.constant 0 : i32
    return %arg0, %c0_i32 : i32, i32
  }
}

</mosaic_0001>

<bundles_post_ra>
// kernel: tpu_custom_call.1
= control target key start
LH: loop header
LB: loop body
LE: loop exit
PB: predicated region body
PF: predicated region fallthrough
CT: control target
= control target key end

     0   :  { %12 = vsyncpa [#allocation3], 0  ;;  %s687_s0 = inlined_call_operand.hbm [shape: f32[8,32], index: 0, kind: input, shape index: {}]   ;;  %s688_s1 = inlined_call_operand.vmem [shape: bf16[32,128], index: 1, kind: input, shape index: {}]   ;;  %s689_s2 = inlined_call_operand.vmem [shape: f32[1,128], index: 2, kind: input, shape index: {}]   ;;  %s690_s3 = inlined_call_operand.vmem [shape: bf16[128,128], index: 3, kind: input, shape index: {}]   ;;  %s691_s4 = inlined_call_operand.vmem [shape: f32[1,128], index: 4, kind: input, shape index: {}]   ;;  %s692_s5 = inlined_call_operand.vmem [shape: bf16[128,16], index: 5, kind: input, shape index: {}]   ;;  %s693_s6 = inlined_call_operand.vmem [shape: f32[1,16], index: 6, kind: input, shape index: {}]   ;;  %s694_s7 = inlined_call_operand.hbm [shape: f32[8,16], index: 7, kind: output, shape index: {}]  }
   0x1   :  { %13 = vsyncpa [#allocation4], 0  ;;  %s529_s24 = smov [#allocation2]   ;;  %s481_s28 = scalar_lea.hbm %s687_s0, 128 }
   0x2   :  { %s20_s25 = sshll.u32 %s529_s24, 4  ;;  %p482_p0 = scmp.ne.s32.totalorder %s687_s0, %s481_s28  ;;  %s21_s25 = int_to_ptr.vmem [resolvable:$true] %s20_s25 }
   0x3   :  { %p485_p1 = scmp.lt.u32.totalorder %s481_s28, %s687_s0 }
   0x5   :  { %p487_p2 = pnand %p485_p1, %p482_p0 }
   0x7   :  { %490 = shalt.err (!%p487_p2)
}
   0x8   :  { %s491_s10 = scalar_lea.vmem %s21_s25, 128  ;;  %p496_p4 = scmp.lt.s32.totalorder %s21_s25, %s21_s25 }
   0x9   :  { %p492_p3 = scmp.ne.s32.totalorder %s21_s25, %s491_s10  ;;  %p497_p5 = scmp.lt.s32.totalorder %s491_s10, %s491_s10 }
   0xb   :  { %p498_p6 = por %p497_p5, %p496_p4 }
   0xd   :  { %p499_p7 = pnand %p498_p6, %p492_p3 }
   0xf   :  { %502 = shalt.err (!%p499_p7)
}
  0x10   :  { %23 = dma.hbm_to_vmem [thread:$0]  %s687_s0, 128, %s21_s25, [#allocation3]  }
  0x11   :  { %525 = dma.done.wait [#allocation3], 128  }
  0x12   :  { %526 = vsyncadd [#allocation3], 4294967168  ;;  %v530_v0 = vmov 0.0   ;;  %vm531_vm0 = vmmov 0   ;;  %v459_v1 = vld [vmem:[%s688_s1] sm:$0xff]   ;;  %v460_v2 = vld [vmem:[%s688_s1 + $0x8] sm:$0xff]  }
  0x13   :  { %407 = vmatprep.subr.bf16.mxu0 %v530_v0  ;;  %411 = vmatprep.mubr.msk.bf16.mxu0 %vm531_vm0, %v530_v0  ;;  %v40_v3 = vld [vmem:[#allocation2] sm:$0xff]  ;;  %v462_v6 = vld [vmem:[%s690_s3 + $0x8] sm:$0xff]   ;;  %vm65_vm1 = vcmask 261120   ;;  %v463_v7 = vld [vmem:[%s690_s3 + $0x10] sm:$0xff]   ;;  %vm336_vm2 = vcmask 130048  }
  0x14   :  { %415 = vmatprep.subr.bf16.mxu1 %v530_v0  ;;  %431 = vmatprep.mubr.msk.bf16.mxu1 %vm531_vm0, %v530_v0  ;;  %v461_v4 = vld [vmem:[%s690_s3] sm:$0xff]   ;;  %v41_v5 = vpack.c.bf16 %v40_v3, %v40_v3  ;;  %v464_v8 = vld [vmem:[%s690_s3 + $0x18] sm:$0xff]   ;;  %v466_v10 = vld [vmem:[%s690_s3 + $0x28] sm:$0xff]  }
  0x15   :  { %408 = vmatpush3.bf16.msra.mxu0 %v459_v1  ;;  %416 = vmatpush3.bf16.msra.mxu1 %v461_v4  ;;  %v465_v9 = vld [vmem:[%s690_s3 + $0x20] sm:$0xff]   ;;  %v467_v11 = vld [vmem:[%s690_s3 + $0x30] sm:$0xff]   ;;  %v468_v12 = vld [vmem:[%s690_s3 + $0x38] sm:$0xff]  }
  0x16   :  { %409 = vmatprep.subr.bf16.mxu0 %v530_v0  ;;  %417 = vmatprep.subr.bf16.mxu1 %v530_v0  ;;  %v469_v13 = vld [vmem:[%s692_s5] sm:$0xff]   ;;  %v470_v14 = vld [vmem:[%s692_s5 + $0x8] sm:$0xff]   ;;  %v471_v15 = vld [vmem:[%s692_s5 + $0x10] sm:$0xff]  }
  0x17   :  { %v472_v16 = vld [vmem:[%s692_s5 + $0x18] sm:$0xff]   ;;  %v473_v17 = vld [vmem:[%s692_s5 + $0x20] sm:$0xff]   ;;  %v474_v18 = vld [vmem:[%s692_s5 + $0x28] sm:$0xff]  }
  0x18   :  { %v364_v19 = vld [vmem:[%s689_s2] ss:$0 sm:$0xff]  ;;  %v475_v27 = vld [vmem:[%s692_s5 + $0x30] sm:$0xff]   ;;  %v476_v28 = vld [vmem:[%s692_s5 + $0x38] sm:$0xff]  }
  0x19   :  { %410 = vmatpush3.bf16.msra.mxu0 %v460_v2  ;;  %418 = vmatpush3.bf16.msra.mxu1 %v462_v6  ;;  %v368_v29 = vld [vmem:[%s691_s4] ss:$0 sm:$0xff]  ;;  %s532_s4 = smov [#allocation5]  }
  0x1a   :  { %435 = vmatprep.subr.bf16.mxu0 %v530_v0  ;;  %419 = vmatprep.subr.bf16.mxu1 %v530_v0  ;;  %v377_v37 = vld [vmem:[%s693_s6] ss:$0 sm:$0xff]  ;;  %s355_s5 = sshll.u32 %s532_s4, 4  ;;  %s356_s5 = int_to_ptr.vmem [resolvable:$true] %s355_s5 }
  0x1b   :  { %s503_s6 = scalar_lea.vmem %s356_s5, 128  ;;  %p508_p9 = scmp.lt.s32.totalorder %s356_s5, %s356_s5 }
  0x1c   :  { %412 = vmatmul.mubr.msk.bf16.vlgmr.msra.gmra.mrb[0].mxu0 %vm65_vm1, %v41_v5  ;;  %p504_p8 = scmp.ne.s32.totalorder %s356_s5, %s503_s6  ;;  %p509_p10 = scmp.lt.s32.totalorder %s503_s6, %s503_s6 }
  0x1d   :  { %451 = vmatprep.mubr.msk.bf16.mxu0 %vm531_vm0, %v530_v0  ;;  %420 = vmatpush3.bf16.msra.mxu1 %v463_v7 }
  0x1e   :  { %421 = vmatprep.subr.bf16.mxu1 %v530_v0  ;;  %436 = vmatpush3.bf16.msra.mxu0 %v469_v13  ;;  %p510_p11 = por %p509_p10, %p508_p9 }
  0x1f   :  { %437 = vmatprep.subr.bf16.mxu0 %v530_v0 }
  0x20   :  { %p511_p12 = pnand %p510_p11, %p504_p8 }
  0x21   :  { %422 = vmatpush3.bf16.msra.mxu1 %v464_v8 }
  0x22   :  { %423 = vmatprep.subr.bf16.mxu1 %v530_v0  ;;  %438 = vmatpush3.bf16.msra.mxu0 %v470_v14 }
  0x23   :  { %439 = vmatprep.subr.bf16.mxu0 %v530_v0 }
  0x25   :  { %424 = vmatpush3.bf16.msra.mxu1 %v465_v9 }
  0x26   :  { %425 = vmatprep.subr.bf16.mxu1 %v530_v0  ;;  %440 = vmatpush3.bf16.msra.mxu0 %v471_v15 }
  0x27   :  { %441 = vmatprep.subr.bf16.mxu0 %v530_v0 }
  0x29   :  { %426 = vmatpush3.bf16.msra.mxu1 %v466_v10 }
  0x2a   :  { %427 = vmatprep.subr.bf16.mxu1 %v530_v0  ;;  %442 = vmatpush3.bf16.msra.mxu0 %v472_v16 }
  0x2b   :  { %443 = vmatprep.subr.bf16.mxu0 %v530_v0 }
  0x2d   :  { %428 = vmatpush3.bf16.msra.mxu1 %v467_v11 }
  0x2e   :  { %429 = vmatprep.subr.bf16.mxu1 %v530_v0  ;;  %444 = vmatpush3.bf16.msra.mxu0 %v473_v17 }
  0x2f   :  { %445 = vmatprep.subr.bf16.mxu0 %v530_v0 }
  0x31   :  { %430 = vmatpush3.bf16.msra.mxu1 %v468_v12 }
  0x32   :  { %446 = vmatpush3.bf16.msra.mxu0 %v474_v18 }
  0x33   :  { %447 = vmatprep.subr.bf16.mxu0 %v530_v0 }
  0x36   :  { %448 = vmatpush3.bf16.msra.mxu0 %v475_v27 }
  0x37   :  { %449 = vmatprep.subr.bf16.mxu0 %v530_v0 }
  0x3a   :  { %450 = vmatpush3.bf16.msra.mxu0 %v476_v28 }
  0xef   :  { %v103_v20 = vpop.f32.mrb[0].mxu0 }
  0xf0   :  { %v104_v21 = vadd.f32 %v364_v19, %v103_v20  ;;  %v413_v22 = vpop.f32.mrb[1].mxu0 }
  0xf1   :  { %v106_v23 = vpop.f32.mrb[2].mxu0 }
  0xf2   :  { %v109_v24 = vmax.f32 %v104_v21, 0.0  ;;  %v414_v25 = vpop.f32.mrb[3].mxu0 }
  0xf4   :  { %v110_v26 = vpack.c.bf16 %v109_v24, %v109_v24 }
  0xf6   :  { %432 = vmatmul.mubr.bf16.vlgmr.msra.gmra.mrb[0].mxu1 %v110_v26 }
 0x1c9   :  { %v216_v30 = vpop.f32.mrb[0].mxu1 }
 0x1ca   :  { %v217_v31 = vadd.f32 %v368_v29, %v216_v30  ;;  %v433_v32 = vpop.f32.mrb[1].mxu1 }
 0x1cb   :  { %v219_v33 = vpop.f32.mrb[2].mxu1 }
 0x1cc   :  { %v222_v34 = vmax.f32 %v217_v31, 0.0  ;;  %v434_v35 = vpop.f32.mrb[3].mxu1 }
 0x1ce   :  { %v223_v36 = vpack.c.bf16 %v222_v34, %v222_v34 }
 0x1d0   :  { %452 = vmatmul.mubr.bf16.vlgmr.msra.gmra.mrb[4].mxu0 %v223_v36 }
 0x2a3   :  { %v329_v38 = vpop.f32.mrb[4].mxu0 }
 0x2a4   :  { %v330_v39 = vadd.f32 %v377_v37, %v329_v38  ;;  %v453_v40 = vpop.f32.mrb[5].mxu0 }
 0x2a5   :  { %v332_v41 = vpop.f32.mrb[6].mxu0 }
 0x2a6   :  { %v335_v42 = vmax.f32 %v330_v39, 0.0  ;;  %v454_v43 = vpop.f32.mrb[7].mxu0 }
 0x2a8   :  { %v337_v44 = vsel %vm336_vm2, %v335_v42, -inf }
 0x2a9   :  { %338 = vmax.xlane.f32.xlu0 %v337_v44 }
 0x336   :  { %v339_v45 = vpop.xlane.xlu0 %338 }
 0x337   :  { %v340_v46 = vsub.f32 %v335_v42, %v339_v45 }
 0x339   :  { %v341_v47 = vmul.f32 1.442695, %v340_v46 }
 0x33b   :  { %477 = vpow2.f32 %v341_v47 }
 0x345   :  { %v478_v48 = vpop.eup %477 }
 0x346   :  { %v343_v49 = vsel %vm336_vm2, %v478_v48, 0.0 }
 0x347   :  { %344 = vadd.xlane.f32.xlu0 %v343_v49 }
 0x3d4   :  { %v345_v50 = vpop.xlane.xlu0 %344 }
 0x3d5   :  { %479 = vrcp.f32 %v345_v50 }
 0x3df   :  { %v480_v51 = vpop.eup %479 }
 0x3e0   :  { %v347_v52 = vmul.f32 %v480_v51, %v478_v48 }
 0x3e2   :  { %348 = vst.msk [vmem:[#allocation5] sm:$0xff] %vm336_vm2, %v347_v52 }
 0x3e3   :  { %514 = shalt.err (!%p511_p12)
}
 0x3e4   :  { %s515_s28 = scalar_lea.hbm %s694_s7, 128 }
 0x3e5   :  { %p516_p13 = scmp.ne.s32.totalorder %s694_s7, %s515_s28  ;;  %p519_p0 = scmp.lt.u32.totalorder %s515_s28, %s694_s7 }
 0x3e7   :  { %p521_p1 = pnand %p519_p0, %p516_p13 }
 0x3e9   :  { %524 = shalt.err (!%p521_p1)
}
 0x3ea   :  { %358 = dma.vmem_to_hbm [thread:$0]  %s356_s5, 128, %s694_s7, [#allocation4]  }
 0x3eb   :  { %527 = dma.done.wait [#allocation4], 128  }
 0x3ec   :  { %528 = vsyncadd [#allocation4], 4294967168 }
 0x3ed   :  { %362 = vsyncpa [#allocation3], 1 }
 0x3ee   :  { %363 = vsyncpa [#allocation4], 1 }

</bundles_post_ra>
